<compile_context>
chip_gen: v7x
topology: tpu7x:2x2x1
jax: 0.10.0
libtpu: 0.0.40
codegen_flags: <defaults>
</compile_context>

<pallas_src>
import functools
import math

import jax
import jax.numpy as jnp
from jax import lax
from jax.experimental import pallas as pl
from jax.experimental.pallas import tpu as pltpu


def _round_up(x, m):
    return (x + m - 1) // m * m


def _layernorm_kernel(alpha_ref, bias_ref, x_ref, o_ref, *, eps, h_real):
    # alpha_ref / bias_ref: (1,) scalars in SMEM.
    # x_ref / o_ref: (block_rows, h_pad) tiles in VMEM; lanes >= h_real are
    # zero padding on input / don't-care on output (sliced off by the wrapper).
    x = x_ref[...].astype(jnp.float32)
    h_pad = x.shape[-1]

    # Padded input lanes are zero, so the raw sum already equals the real sum.
    mean = jnp.sum(x, axis=-1, keepdims=True) * jnp.float32(1.0 / h_real)
    d = x - mean
    if h_pad != h_real:  # static branch: mask padded lanes out of the variance
        lane = lax.broadcasted_iota(jnp.int32, x.shape, x.ndim - 1)
        d_sq = jnp.where(lane < h_real, d, 0.0)
    else:
        d_sq = d
    # torch.std default = unbiased estimator (divide by H - 1); NaN when H == 1,
    # matching torch semantics. eps is added to std (NOT inside the sqrt).
    var = jnp.sum(d_sq * d_sq, axis=-1, keepdims=True) / jnp.float32(h_real - 1)
    std = jnp.sqrt(var)

    # One reciprocal per row + broadcast multiply instead of a per-element
    # divide; alpha folded into the per-row scale. approx=False keeps the 1e-5
    # tolerance (hardware-approx reciprocal is only ~2^-12 accurate).
    inv = pl.reciprocal(std + jnp.float32(eps), approx=False)
    scale = alpha_ref[0] * inv
    out = d * scale + bias_ref[0]
    o_ref[...] = out.astype(o_ref.dtype)  # cast last, after scale + bias


def _choose_block_rows(rows, h_pad, in_bytes, out_bytes,
                       pipeline_budget_bytes=16 * 1024 * 1024,
                       max_block_rows=1024):
    """Largest row tile whose double-buffered in+out pipeline fits the budget.

    ~16 MiB of in-flight buffers stays safely under v7x's 64 MiB physical VMEM
    and under the 32 MiB scoped limit we request explicitly (also raising v5e's
    16 MiB default), while being large enough (e.g. 256+ rows at H=4096 f32) to
    amortize the ~0.35 us per-grid-step pipeline overhead.
    """
    per_row = 2 * h_pad * (in_bytes + out_bytes)  # 2 buffers x (in + out) per row
    br = pipeline_budget_bytes // per_row
    br = min(br, max_block_rows, max(8, _round_up(rows, 8)))
    if rows > 8:
        # Keep >= 2 grid steps so both v7x TensorCores get work.
        br = min(br, _round_up((rows + 1) // 2, 8))
    return int(max(8, (br // 8) * 8))


def layer_normalization(x, alpha, bias, *, eps=1e-6, block_rows=None,
                        vmem_limit_bytes=32 * 1024 * 1024):
    """Pallas TPU implementation of the reference LayerNormalization.forward."""
    orig_shape = x.shape
    h = orig_shape[-1]
    rows = math.prod(orig_shape[:-1])
    x2 = x.reshape(rows, h)

    # Lane-dense hidden axis: pad to a multiple of 128 so stores are full-width.
    h_pad = _round_up(h, 128)
    in_bytes = x2.dtype.itemsize
    out_bytes = in_bytes

    if block_rows is None:
        block_rows = _choose_block_rows(rows, h_pad, in_bytes, out_bytes)
    rows_pad = _round_up(rows, block_rows)

    needs_pad = (rows_pad != rows) or (h_pad != h)
    if needs_pad:
        # Zero padding: padded rows normalize to finite values (just `bias`) and
        # are sliced off below; padded lanes are masked inside the kernel.
        x2 = jnp.pad(x2, ((0, rows_pad - rows), (0, h_pad - h)))

    cost = pl.CostEstimate(
        flops=7 * rows * h,
        transcendentals=2 * rows,  # sqrt + reciprocal per row
        bytes_accessed=rows * h * (in_bytes + out_bytes),
    )

    out = pl.pallas_call(
        functools.partial(_layernorm_kernel, eps=eps, h_real=h),
        out_shape=jax.ShapeDtypeStruct((rows_pad, h_pad), x.dtype),
        grid=(rows_pad // block_rows,),
        in_specs=[
            pl.BlockSpec(memory_space=pltpu.SMEM),               # alpha (1,)
            pl.BlockSpec(memory_space=pltpu.SMEM),               # bias  (1,)
            pl.BlockSpec((block_rows, h_pad), lambda i: (i, 0)),  # x tile
        ],
        out_specs=pl.BlockSpec((block_rows, h_pad), lambda i: (i, 0)),
        compiler_params=pltpu.CompilerParams(
            dimension_semantics=("parallel",),
            vmem_limit_bytes=vmem_limit_bytes,
        ),
        cost_estimate=cost,
    )(alpha, bias, x2)

    if needs_pad:
        out = out[:rows, :h]
    return out.reshape(orig_shape)


def _reference(x, alpha, bias, eps=1e-6):
    x = x.astype(jnp.float32)
    mean = jnp.mean(x, axis=-1, keepdims=True)
    std = jnp.std(x, axis=-1, keepdims=True, ddof=1)  # unbiased, like torch.std
    return alpha * (x - mean) / (std + eps) + bias


if __name__ == "__main__":
    key = jax.random.PRNGKey(0)
    k1, k2 = jax.random.split(key)

    # Deterministic params, matching nn.Parameter(torch.ones(1) / torch.zeros(1)).
    alpha = jnp.ones((1,), dtype=jnp.float32)
    bias = jnp.zeros((1,), dtype=jnp.float32)

    # Small demo shape consistent with the module (batch, seq, hidden).
    # hidden=32 exercises the lane-padding / masked-variance path.
    x = jax.random.normal(k1, (2, 8, 32), dtype=jnp.float32)
    out = jax.block_until_ready(layer_normalization(x, alpha, bias, eps=1e-6))
    ref = _reference(x, alpha[0], bias[0], eps=1e-6)
    assert out.shape == x.shape
    assert jnp.allclose(out, ref, atol=1e-5, rtol=1e-5)

    # Second case: rows not a multiple of the row tile, lane-dense hidden (128).
    x2 = jax.random.normal(k2, (3, 5, 128), dtype=jnp.float32)
    out2 = jax.block_until_ready(layer_normalization(x2, alpha, bias, eps=1e-6))
    ref2 = _reference(x2, alpha[0], bias[0], eps=1e-6)
    assert out2.shape == x2.shape
    assert jnp.allclose(out2, ref2, atol=1e-5, rtol=1e-5)

    print("KERNEL_OK")
</pallas_src>

<mosaic_0001>
module attributes {stable_mosaic.version = 11 : i64} {
  func.func @_layernorm_kernel(%arg0: i32, %arg1: memref<1xf32, #tpu.memory_space<smem>>, %arg2: memref<1xf32, #tpu.memory_space<smem>>, %arg3: memref<8x128xf32, #tpu.memory_space<vmem>>, %arg4: memref<8x128xf32, #tpu.memory_space<vmem>>) attributes {dimension_semantics = [#tpu.dimension_semantics<parallel>], iteration_bounds = array<i64: 2>, scalar_prefetch = 0 : i64, scratch_operands = 0 : i64, tpu.core_type = #tpu.core_type<tc>, window_params = [{transform_indices = @transform_0, window_bounds = array<i64: 1>}, {transform_indices = @transform_1, window_bounds = array<i64: 1>}, {transform_indices = @transform_2, window_bounds = array<i64: 8, 128>}, {transform_indices = @transform_3, window_bounds = array<i64: 8, 128>}]} {
    %c0 = arith.constant 0 : index
    %c0_0 = arith.constant 0 : index
    %0 = vector.load %arg3[%c0, %c0_0] : memref<8x128xf32, #tpu.memory_space<vmem>>, vector<8x128xf32>
    %cst = arith.constant dense<0.000000e+00> : vector<8xf32>
    %1 = vector.multi_reduction <add>, %0, %cst [1] : vector<8x128xf32> to vector<8xf32>
    %2 = vector.shape_cast %1 : vector<8xf32> to vector<8x1xf32>
    %cst_1 = arith.constant 3.125000e-02 : f32
    %3 = vector.broadcast %cst_1 : f32 to vector<8x1xf32>
    %4 = arith.mulf %2, %3 : vector<8x1xf32>
    %5 = vector.broadcast %4 : vector<8x1xf32> to vector<8x128xf32>
    %6 = arith.subf %0, %5 : vector<8x128xf32>
    %7 = tpu.iota {dimensions = array<i32: 1>} : vector<8x128xi32>
    %c32_i32 = arith.constant 32 : i32
    %8 = vector.broadcast %c32_i32 : i32 to vector<8x128xi32>
    %9 = arith.cmpi slt, %7, %8 : vector<8x128xi32>
    %cst_2 = arith.constant 0.000000e+00 : f32
    %10 = vector.broadcast %cst_2 : f32 to vector<8x128xf32>
    %11 = arith.select %9, %6, %10 : vector<8x128xi1>, vector<8x128xf32>
    %12 = arith.mulf %11, %11 : vector<8x128xf32>
    %cst_3 = arith.constant dense<0.000000e+00> : vector<8xf32>
    %13 = vector.multi_reduction <add>, %12, %cst_3 [1] : vector<8x128xf32> to vector<8xf32>
    %14 = vector.shape_cast %13 : vector<8xf32> to vector<8x1xf32>
    %cst_4 = arith.constant 3.100000e+01 : f32
    %15 = vector.broadcast %cst_4 : f32 to vector<8x1xf32>
    %16 = arith.divf %14, %15 : vector<8x1xf32>
    %17 = math.sqrt %16 : vector<8x1xf32>
    %cst_5 = arith.constant 9.99999997E-7 : f32
    %18 = vector.broadcast %cst_5 : f32 to vector<8x1xf32>
    %19 = arith.addf %17, %18 : vector<8x1xf32>
    %20 = tpu.reciprocal %19 : vector<8x1xf32> -> vector<8x1xf32>
    %c0_6 = arith.constant 0 : index
    %21 = memref.load %arg1[%c0_6] : memref<1xf32, #tpu.memory_space<smem>>
    %22 = vector.broadcast %21 : f32 to vector<8x1xf32>
    %23 = arith.mulf %22, %20 : vector<8x1xf32>
    %24 = vector.broadcast %23 : vector<8x1xf32> to vector<8x128xf32>
    %25 = arith.mulf %6, %24 : vector<8x128xf32>
    %c0_7 = arith.constant 0 : index
    %26 = memref.load %arg2[%c0_7] : memref<1xf32, #tpu.memory_space<smem>>
    %27 = vector.broadcast %26 : f32 to vector<8x128xf32>
    %28 = arith.addf %25, %27 : vector<8x128xf32>
    %c0_8 = arith.constant 0 : index
    %c0_9 = arith.constant 0 : index
    %29 = vector.load %arg4[%c0_8, %c0_9] : memref<8x128xf32, #tpu.memory_space<vmem>>, vector<8x128xf32>
    tpu.vector_store %arg4[%c0_8, %c0_9], %28 {strides = array<i32>} : memref<8x128xf32, #tpu.memory_space<vmem>>, vector<8x128xf32>,
    return
  }
  func.func @transform_0(%arg0: i32) -> i32 {
    %c0_i32 = arith.constant 0 : i32
    %c0_i32_0 = arith.constant 0 : i32
    return %c0_i32 : i32
  }
  func.func @transform_1(%arg0: i32) -> i32 {
    %c0_i32 = arith.constant 0 : i32
    %c0_i32_0 = arith.constant 0 : i32
    return %c0_i32 : i32
  }
  func.func @transform_2(%arg0: i32) -> (i32, i32) {
    %c0_i32 = arith.constant 0 : i32
    %c0_i32_0 = arith.constant 0 : i32
    return %arg0, %c0_i32 : i32, i32
  }
  func.func @transform_3(%arg0: i32) -> (i32, i32) {
    %c0_i32 = arith.constant 0 : i32
    %c0_i32_0 = arith.constant 0 : i32
    return %arg0, %c0_i32 : i32, i32
  }
}

</mosaic_0001>

<bundles_post_ra>
// kernel: tpu_custom_call.1
= control target key start
LH: loop header
LB: loop body
LE: loop exit
PB: predicated region body
PF: predicated region fallthrough
CT: control target
= control target key end

     0   :  { %s656_s0 = inlined_call_operand.<no memory space> [shape: f32[1], index: 0, kind: input, shape index: {}]   ;;  %s657_s1 = inlined_call_operand.<no memory space> [shape: f32[1], index: 1, kind: input, shape index: {}]   ;;  %s658_s2 = inlined_call_operand.hbm [shape: f32[16,128], index: 2, kind: input, shape index: {}]   ;;  %s659_s3 = inlined_call_operand.hbm [shape: f32[16,128], index: 3, kind: output, shape index: {}]  }
   0x1   :  { %8 = sst [smem:[#allocation2]] %s656_s0 }
   0x2   :  { %9 = sst [smem:[#allocation3]] %s657_s1 }
   0x3   :  { %10 = vsyncpa [#allocation5], 0 }
   0x4   :  { %12 = vsyncpa [#allocation5 + $0x1], 0 }
   0x5   :  { %13 = vsyncpa [#allocation6], 0 }
   0x6   :  { %15 = vsyncpa [#allocation6 + $0x1], 0  ;;  %s491_s16 = smov 0   ;;  %s493_s17 = smov 0  }
   0x7   :  { %s495_s18 = smov 0   ;;  %s497_s19 = smov 0  }
   0x8 LB: > { %s512_s0 = sadd.s32 4294967295, %s461_s19   ;;  %s303_s1 = sadd.s32 4294967294, %s461_s19   ;;  %s461_s19 = sphi %s497_s19, %s674_s19   ;;  %s457_s18 = sphi %s495_s18, %s673_s18   ;;  %s453_s17 = sphi %s493_s17, %s672_s17   ;;  %s449_s16 = sphi %s491_s16, %s671_s16  }
   0x9   : > { %s516_s20 = sadd.s32 1, %s461_s19   ;;  %s70_s21 = sadd.s32 1, %s457_s18 }
   0xa   : > { %s67_s22 = ssub.s32 %s461_s19, %s516_s20  ;;  %p77_p0 = scmp.ne.s32.totalorder %s457_s18, %s453_s17 }
   0xb   : > { %p68_p1 = scmp.eq.s32.totalorder %s67_s22, 0  ;;  %p78_p2 = scmp.eq.s32.totalorder %s461_s19, 0 }
   0xc   : > { %p83_p3 = scmp.ne.s32.totalorder %s453_s17, %s449_s16  ;;  %p84_p4 = scmp.eq.s32.totalorder %s512_s0, 0 }
   0xd   : > { %s528_s23 = scalar_select %p68_p1, %s457_s18, %s70_s21  }
   0xe   : > { %p530_p5 = por %p78_p2, %p77_p0  ;;  %p534_p6 = por %p84_p4, %p83_p3 }
   0xf   : > { %p107_p7 = scmp.eq.s32.totalorder %s512_s0, 1  ;;  %p113_p8 = scmp.eq.s32.totalorder %s303_s1, 1 }
  0x10   : > { %p327_p10 = scmp.lt.s32.totalorder %s461_s19, 2  ;;  %s139_s28 = sand.u32 1, %s457_s18  }
  0x11   : > { %p541_p11 = por %p107_p7, %p77_p0  ;;  %p545_p12 = por %p113_p8, %p83_p3 }
  0x12   : > { %s307_s29 = sshll.u32 %s461_s19, 7  ;;  %s306_s30 = sshll.u32 %s139_s28, 3 }
  0x13   : > { %s663_s26 = scalar_select %p541_p11, 1, 0 }
  0x14   : > { %s664_s27 = scalar_select %p545_p12, 1, 0 }
  0x15   : > { %s554_s6 = scalar_lea.hbm %s658_s2, %s307_s29  ;;  %s143_s7 = scalar_lea.vmem [#allocation4], %s306_s30 }
  0x16   : > { %s150_s8 = sshll.u32 %s143_s7, 4  ;;  %p558_p13 = pnand %p327_p10, %p530_p5  ;;  %s562_s8 = int_to_ptr.vmem [resolvable:$true] %s150_s8 }
  0x17   : > { %s140_s10 = scalar_lea.sflag [#allocation5], %s139_s28  ;;  %s365_s11 = scalar_lea.hbm %s554_s6, 128 }
  0x18   : > { %p366_p2 = scmp.ne.s32.totalorder %s554_s6, %s365_s11  ;;  %p367_p3 = pneg %p558_p13 }
  0x19   : > { %s370_s14 = scalar_lea.hbm %s658_s2, 256  ;;  %p371_p5 = scmp.lt.u32.totalorder %s554_s6, %s658_s2 }
  0x1a   : > { %p368_p4 = pnand %p367_p3, %p366_p2  ;;  %p372_p8 = scmp.lt.u32.totalorder %s370_s14, %s365_s11 }
  0x1b   : > { %p374_p9 = scmp.lt.u32.totalorder %s365_s11, %s554_s6 }
  0x1c   : > { %p369_p7 = pneg %p368_p4  ;;  %p373_p10 = por %p372_p8, %p371_p5 }
  0x1e   : > { %p375_p0 = por %p374_p9, %p373_p10 }
  0x20   : > { %p376_p1 = pnand %p375_p0, %p369_p7 }
  0x22   : > { %379 = shalt.err (!%p376_p1)
}
  0x23   : > { %s380_s21 = scalar_lea.vmem %s562_s8, 128  ;;  %s463_s22 = smov [#allocation4]  }
  0x24   : > { %p381_p2 = scmp.ne.s32.totalorder %s562_s8, %s380_s21  ;;  %s385_s24 = sshll.u32 %s463_s22, 4  ;;  %s386_s24 = int_to_ptr.vmem [resolvable:$false] %s385_s24 }
  0x25   : > { %s387_s28 = scalar_lea.vmem %s386_s24, 256  ;;  %p388_p11 = scmp.lt.s32.totalorder %s562_s8, %s386_s24 }
  0x26   : > { %p383_p4 = pnand %p381_p2, %p367_p3  ;;  %p389_p5 = scmp.lt.s32.totalorder %s387_s28, %s380_s21 }
  0x28   : > { %p384_p12 = pneg %p383_p4  ;;  %p390_p8 = por %p389_p5, %p388_p11 }
  0x2a   : > { %p391_p9 = pnand %p390_p8, %p384_p12 }
  0x2c   : > { %394 = shalt.err (!%p391_p9)
}
  0x2d   : > { %322 = dma.hbm_to_vmem [thread:$0]  (!%p558_p13), %s554_s6, 128, %s562_s8, %s140_s10  }
  0x2e   : > { %p666_p0 = scmp.lt.s32.totalorder %s461_s19, 3  ;;  %p667_p1 = scmp.ge.s32.totalorder %s461_s19, 1 }
  0x30   : > { %p156_p3 = pnand %p667_p1, %p666_p0 }
  0x31   : > { %s596_s29 = sand.u32 (!%p156_p3), 1, %s453_s17  }
  0x32   : > { %159 = sbr.rel (%p156_p3) target bundleno = 400 (0x190), region = 32  ;;  %s309_s30 = sshll.u32 (!%p156_p3), %s596_s29, 3 }
  0x33   : > { %s162_s4 = scalar_lea.sflag (!%p156_p3), [#allocation5], %s596_s29  ;;  %s165_s5 = scalar_lea.vmem (!%p156_p3), [#allocation4], %s309_s30 }
  0x39   : > { %440 = dma.done.wait (%p534_p6), %s162_s4, 128  }
  0x3a   : > { %442 = vsyncadd (%p534_p6), %s162_s4, 4294967168  ;;  %v188_v0 = vld [vmem:[%s165_s5] sm:$0xff]  ;;  %v193_v1 = vlaneseq  ;;  %s211_s25 = sld [smem:[#allocation2]]  ;;  %s312_s7 = sshll.u32 %s512_s0, 7 }
  0x3b   : > { %189 = vadd.xlane.f32.xlu0 %v188_v0  ;;  %s215_s6 = sld [smem:[#allocation3]]  ;;  %s187_s8 = scalar_lea.vmem [#allocation7], %s309_s30 }
  0x3c   : > { %v194_v2 = vand.u32 127, %v193_v1  ;;  %s233_s9 = sshll.u32 %s187_s8, 4  ;;  %s612_s12 = scalar_lea.hbm %s659_s3, %s312_s7  ;;  %s614_s9 = int_to_ptr.vmem [resolvable:$true] %s233_s9 }
  0x3d   : > { %s220_s13 = scalar_lea.sflag [#allocation6], %s596_s29  ;;  %s395_s14 = scalar_lea.vmem %s614_s9, 128 }
  0x3e   : > { %vm195_vm0 = vcmp.lt.s32.totalorder %v194_v2, 32  ;;  %p396_p6 = scmp.ne.s32.totalorder %s614_s9, %s395_s14  ;;  %p668_p11 = scmp.ne.s32.totalorder %s663_s26, 0 }
  0x3f   : > { %s464_s0 = smov [#allocation7]  }
  0x40   : > { %v212_v16 = vstv %s211_s25  ;;  %p397_p12 = pnand %p396_p6, %p668_p11  ;;  %s399_s15 = sshll.u32 %s464_s0, 4  ;;  %s400_s15 = int_to_ptr.vmem [resolvable:$false] %s399_s15 }
  0x41   : > { %v216_v19 = vstv %s215_s6  ;;  %s401_s1 = scalar_lea.vmem %s400_s15, 256  ;;  %p402_p7 = scmp.lt.s32.totalorder %s614_s9, %s400_s15 }
  0x42   : > { %p398_p13 = pneg %p397_p12  ;;  %p403_p10 = scmp.lt.s32.totalorder %s401_s1, %s395_s14 }
  0x44   : > { %p404_p2 = por %p403_p10, %p402_p7 }
  0x46   : > { %p405_p4 = pnand %p404_p2, %p398_p13 }
  0xc8   : > { %v190_v3 = vpop.xlane.xlu0 %189 }
  0xc9   : > { %v191_v4 = vmul.f32 0.03125, %v190_v3 }
  0xcb   : > { %v192_v5 = vsub.f32 %v188_v0, %v191_v4 }
  0xcd   : > { %v196_v6 = vsel %vm195_vm0, %v192_v5, 0.0 }
  0xce   : > { %v197_v7 = vmul.f32 %v196_v6, %v196_v6 }
  0xd0   : > { %198 = vadd.xlane.f32.xlu0 %v197_v7 }
 0x15d   : > { %v199_v8 = vpop.xlane.xlu0 %198 }
 0x15e   : > { %v201_v9 = vmul.f32 0.032258064, %v199_v8 }
 0x160   : > { %361 = vrsqrt.f32 %v201_v9  ;;  %vm204_vm1 = vcmp.eq.f32.partialorder %v201_v9, inf  ;;  %v207_v12 = vand.u32 2147483648, %v201_v9  ;;  %vm206_vm2 = vcmp.eq.f32.partialorder %v201_v9, 0.0 }
 0x16a   : > { %v362_v10 = vpop.eup %361 }
 0x16b   : > { %v203_v11 = vmul.f32 %v362_v10, %v201_v9 }
 0x16d   : > { %v205_v13 = vsel %vm204_vm1, %v201_v9, %v203_v11 }
 0x16e   : > { %v208_v14 = vsel %vm206_vm2, %v207_v12, %v205_v13 }
 0x16f   : > { %v209_v15 = vadd.f32 1e-06, %v208_v14 }
 0x171   : > { %363 = vrcp.f32 %v209_v15 }
 0x17b   : > { %v364_v17 = vpop.eup %363 }
 0x17c   : > { %v213_v18 = vmul.f32 %v364_v17, %v212_v16 }
 0x17e   : > { %v214_v20 = vmul.f32 %v213_v18, %v192_v5 }
 0x180   : > { %v217_v21 = vadd.f32 %v216_v19, %v214_v20 }
 0x182   : > { %218 = vst [vmem:[%s187_s8] sm:$0xff] %v217_v21 }
 0x183   : > { %408 = shalt.err (!%p405_p4)
}
 0x184   : > { %s409_s21 = scalar_lea.hbm %s612_s12, 128  ;;  %s413_s28 = scalar_lea.hbm %s659_s3, 256 }
 0x185   : > { %p410_p5 = scmp.ne.s32.totalorder %s612_s12, %s409_s21  ;;  %p414_p0 = scmp.lt.u32.totalorder %s612_s12, %s659_s3 }
 0x186   : > { %p415_p1 = scmp.lt.u32.totalorder %s413_s28, %s409_s21  ;;  %p417_p6 = scmp.lt.u32.totalorder %s409_s21, %s612_s12 }
 0x187   : > { %p411_p8 = pnand %p410_p5, %p668_p11 }
 0x188   : > { %p416_p3 = por %p415_p1, %p414_p0 }
 0x189   : > { %p412_p9 = pneg %p411_p8 }
 0x18a   : > { %p418_p12 = por %p417_p6, %p416_p3 }
 0x18c   : > { %p419_p13 = pnand %p418_p12, %p412_p9 }
 0x18e   : > { %422 = shalt.err (!%p419_p13)
}
 0x18f   : > { %317 = dma.vmem_to_hbm [thread:$0]  (%p668_p11), %s614_s9, 128, %s612_s12, %s220_s13  }
 0x190 PF: > { %s245_s4 = sand.u32 1, %s449_s16   ;;  %p669_p7 = scmp.ne.s32.totalorder %s664_s27, 0 }
 0x191   : > { %p670_p10 = scmp.ge.s32.totalorder %s461_s19, 2  ;;  %s246_s5 = scalar_lea.sflag [#allocation6], %s245_s4 }
 0x193   : > { %p324_p2 = pnand %p670_p10, %p669_p7 }
 0x195   : > { %444 = dma.done.wait (!%p324_p2), %s246_s5, 128  }
 0x196   : > { %446 = vsyncadd (!%p324_p2), %s246_s5, 4294967168  ;;  %p18_p4 = scmp.ge.s32.totalorder %s516_s20, 4   ;;  %s671_s16 = smov %s453_s17 }
 0x197   : > { %s672_s17 = smov %s457_s18  ;;  %s673_s18 = smov %s528_s23 }
 0x198   : > { %s674_s19 = smov %s516_s20  ;;  %20 = sbr.rel (!%p18_p4) target bundleno = 8 (0x8), region = 77 }
 0x19f   :  { %251 = vsyncpa [#allocation5], 1 }
 0x1a0   :  { %253 = vsyncpa [#allocation5 + $0x1], 1 }
 0x1a1   :  { %254 = vsyncpa [#allocation6], 1 }
 0x1a2   :  { %256 = vsyncpa [#allocation6 + $0x1], 1 }

</bundles_post_ra>
